<compile_context>
chip_gen: v6e
topology: v6e:2x2x1
jax: 0.10.0
libtpu: 0.0.40
codegen_flags: <defaults>
</compile_context>

<pallas_src>
import numpy as np

import jax
import jax.numpy as jnp
from jax.experimental import pallas as pl
from jax.experimental.pallas import tpu as pltpu


_LANE = 128            # lane width
_SUBLANE = 8           # f32 sublane count
_T_BLK_MAX = 256       # max targets per block (sublane axis)
_SPLIT_BYTES = 1 << 20 # split the T axis across 2 TCs above this input size


def _round_up(x: int, m: int) -> int:
    return -(-x // m) * m


def _l_blk_cap() -> int:
    """Per-generation cap on the lane (reduction) block extent."""
    try:
        kind = jax.devices()[0].device_kind.lower()
    except Exception:
        return 2048
    if "v5" in kind:
        # v5e scoped-VMEM default is 16 MiB: 2 x (2 MiB packed tile) + out fits.
        return 2048
    if "v6" in kind or "v7" in kind:
        # v6e/v7x scoped default 32 MiB: 2 x (8 MiB packed tile) + out fits.
        return 4096
    return 2048


# --------------------------------------------------------------------------
# Pallas kernel: per-target "any degenerate box" flag (per-lane OR slab)
# --------------------------------------------------------------------------
def _make_box_check_kernel(n_chunks: int, single_pass: bool):
    """Builds a kernel for a (2, T_blk, n_chunks*128) packed tile.

    Output is a (T_blk, 128) i32 slab; lane j holds the OR over all lane
    positions congruent to j.  Host finishes with .any(axis=-1).
    """

    def kernel(packed_ref, out_ref):
        mins_ref = packed_ref.at[0]   # (T_blk, L_blk) view, no load yet
        maxs_ref = packed_ref.at[1]

        acc = None
        for c in range(n_chunks):           # static unroll, pure VPU work
            lo = c * _LANE
            viol = mins_ref[:, lo:lo + _LANE] >= maxs_ref[:, lo:lo + _LANE]
            acc = viol if acc is None else jnp.logical_or(acc, viol)
        acc_i32 = acc.astype(jnp.int32)      # (T_blk, 128)

        if single_pass:
            # 1-D grid over T: each block owns its output tile outright.
            out_ref[...] = acc_i32
        else:
            # L is a reduction grid axis: out_ref is resident across it.
            @pl.when(pl.program_id(1) == 0)
            def _():
                out_ref[...] = jnp.zeros_like(out_ref)

            out_ref[...] = jnp.maximum(out_ref[...], acc_i32)

    return kernel


def box_violation_flags(packed: jnp.ndarray) -> jnp.ndarray:
    """packed: (2, T_pad, L) f32 with packed[0]=mins, packed[1]=maxs.

    Returns (T_pad, 128) i32; target i has a degenerate box iff
    flags[i].any() (min >= max on any coordinate).
    """
    two, t_pad, l_total = packed.shape
    assert two == 2
    assert t_pad % _SUBLANE == 0 and l_total % _LANE == 0

    l_cap = _l_blk_cap()
    l_blk = l_total if l_total <= l_cap else l_cap
    assert l_total % l_blk == 0

    t_blk = t_pad if t_pad <= _T_BLK_MAX else _T_BLK_MAX
    assert t_pad % t_blk == 0
    # v7x megacore: make sure the "parallel" T axis has >=2 blocks once the
    # input is big enough to amortize dual-core launch overhead.
    if (t_pad // t_blk) < 2 and packed.nbytes >= _SPLIT_BYTES and t_pad % (2 * _SUBLANE) == 0:
        t_blk = t_pad // 2

    n_chunks = l_blk // _LANE
    single_pass = l_total == l_blk
    kernel = _make_box_check_kernel(n_chunks, single_pass)

    if single_pass:
        grid = (t_pad // t_blk,)
        in_specs = [pl.BlockSpec((2, t_blk, l_blk), lambda i: (0, i, 0))]
        out_specs = pl.BlockSpec((t_blk, _LANE), lambda i: (i, 0))
        semantics = ("parallel",)
    else:
        grid = (t_pad // t_blk, l_total // l_blk)
        in_specs = [pl.BlockSpec((2, t_blk, l_blk), lambda i, l: (0, i, l))]
        out_specs = pl.BlockSpec((t_blk, _LANE), lambda i, l: (i, 0))
        semantics = ("parallel", "arbitrary")

    return pl.pallas_call(
        kernel,
        out_shape=jax.ShapeDtypeStruct((t_pad, _LANE), jnp.int32),
        grid_spec=pltpu.PrefetchScalarGridSpec(
            num_scalar_prefetch=0,
            grid=grid,
            in_specs=in_specs,
            out_specs=out_specs,
        ),
        compiler_params=pltpu.CompilerParams(
            dimension_semantics=semantics,
        ),
    )(packed)


def _pack_targets(targets):
    """Host-side (numpy) lane-dense packing of per-target boxes.

    Returns packed (2, T_pad, L) f32 where
      packed[0, i, 2j:2j+2] = (x1, y1) of box j of target i   (mins)
      packed[1, i, 2j:2j+2] = (x2, y2) of box j of target i   (maxs)
    Padding positions get mins=0.0, maxs=1.0 -> never flag as violations.
    """
    t = len(targets)
    n_max = max(int(tg["boxes"].shape[0]) for tg in targets)
    l_cap = _l_blk_cap()
    l_total = _round_up(max(2 * n_max, 1), _LANE)
    if l_total > l_cap:
        l_total = _round_up(l_total, l_cap)
    t_pad = _round_up(t, _SUBLANE)
    if t_pad > _T_BLK_MAX:
        t_pad = _round_up(t_pad, _T_BLK_MAX)

    packed = np.empty((2, t_pad, l_total), np.float32)
    packed[0].fill(0.0)
    packed[1].fill(1.0)
    for i, tg in enumerate(targets):
        b = np.asarray(tg["boxes"], np.float32)  # (N_i, 4)
        n = int(b.shape[0])
        if n:
            packed[0, i, : 2 * n] = b[:, :2].reshape(-1)
            packed[1, i, : 2 * n] = b[:, 2:].reshape(-1)
    return jnp.asarray(packed)


# --------------------------------------------------------------------------
# JAX-side port of the LossFunction base class
# --------------------------------------------------------------------------
class LossFunction:
    # Class-level one-shot flag, matching the reference semantics (check runs
    # once per process, then is disabled for all instances).
    _checked_targets = True

    def __init__(self, **kwargs) -> None:
        pass

    def forward(self, inputs, targets):
        # Abstract in the reference module; concrete subclasses implement it.
        raise NotImplementedError

    __call__ = forward

    @classmethod
    def copy_targets(cls, targets):
        if targets is not None:
            targets_copy = []
            for target in targets:
                targets_copy.append({k: v for k, v in target.items()})
            targets = targets_copy
        return targets

    @classmethod
    def check_targets(cls, targets) -> None:
        if cls._checked_targets:
            if not targets:
                cls._checked_targets = False
                return
            # Shape / dtype glue checks stay in Python (as in the reference).
            for target in targets:
                boxes = target["boxes"]
                if not isinstance(boxes, jnp.ndarray):
                    raise ValueError("Expected target boxes to be Tensor.")
                if boxes.ndim != 2 or boxes.shape[1] != 4:
                    raise ValueError("Expected target boxes to be a tensor of [N, 4].")

            # Hot path (compare + any-reduction) runs in the Pallas kernel.
            packed = _pack_targets(targets)
            flags = jax.block_until_ready(box_violation_flags(packed))
            # Per-lane OR slab -> host finishes the reduction over lanes.
            violated = np.asarray(flags)[: len(targets)].any(axis=1)

            for flag, target in zip(violated.tolist(), targets):
                if flag:
                    raise ValueError(f"{target['boxes']}")
                if target["labels"].ndim != 1:
                    raise ValueError("Expected target boxes to be a tensor of [N].")
            cls._checked_targets = False

    def decode(self, targets):
        for _ in targets:
            pass


# --------------------------------------------------------------------------
# Demo
# --------------------------------------------------------------------------
if __name__ == "__main__":
    key = jax.random.PRNGKey(0)
    num_targets, n_boxes = 2, 5

    targets = []
    for i in range(num_targets):
        key, k1, k2 = jax.random.split(key, 3)
        xy_min = jax.random.uniform(k1, (n_boxes, 2), jnp.float32, 0.0, 0.4)
        wh = jax.random.uniform(k2, (n_boxes, 2), jnp.float32, 0.1, 0.5)
        boxes = jnp.concatenate([xy_min, xy_min + wh], axis=1)  # valid: x1<x2, y1<y2
        labels = jnp.arange(n_boxes, dtype=jnp.int32)
        targets.append({"boxes": boxes, "labels": labels})

    loss_fn = LossFunction()
    targets = LossFunction.copy_targets(targets)
    LossFunction.check_targets(targets)  # runs the Pallas kernel + blocks
    loss_fn.decode(targets)

    # Sanity: kernel flags an intentionally degenerate box (same (2, 8, 128)
    # shape as the check above, so the compile is reused).
    bad = np.empty((2, 8, 128), np.float32)
    bad[0].fill(0.0)
    bad[1].fill(1.0)
    bad[0, 0, 0] = 0.5
    bad[1, 0, 0] = 0.2  # min >= max -> violation for target 0 only
    bad_flags = jax.block_until_ready(box_violation_flags(jnp.asarray(bad)))
    bad_flags = np.asarray(bad_flags)
    assert bool(bad_flags[0].any())
    assert not bool(bad_flags[1].any())

    print("KERNEL_OK")
</pallas_src>

<mosaic_0001>
module attributes {stable_mosaic.version = 11 : i64} {
  func.func @kernel(%arg0: i32, %arg1: memref<2x8x128xf32, #tpu.memory_space<vmem>>, %arg2: memref<8x128xi32, #tpu.memory_space<vmem>>) attributes {dimension_semantics = [#tpu.dimension_semantics<parallel>], iteration_bounds = array<i64: 1>, scalar_prefetch = 0 : i64, scratch_operands = 0 : i64, tpu.core_type = #tpu.core_type<tc>, window_params = [{transform_indices = @transform_0, window_bounds = array<i64: 2, 8, 128>}, {transform_indices = @transform_1, window_bounds = array<i64: 8, 128>}]} {
    %c0_i32 = arith.constant 0 : i32
    %c0_i32_0 = arith.constant 0 : i32
    %c0_i32_1 = arith.constant 0 : i32
    %0 = tpu.memref_slice %arg1[%c0_i32, %c0_i32_0, %c0_i32_1] : memref<2x8x128xf32, #tpu.memory_space<vmem>> -> memref<1x8x128xf32, #tpu.memory_space<vmem>>
    %1 = tpu.memref_squeeze %0 : memref<1x8x128xf32, #tpu.memory_space<vmem>> -> memref<8x128xf32, #tpu.memory_space<vmem>>
    %c0 = arith.constant 0 : index
    %c0_2 = arith.constant 0 : index
    %2 = vector.load %1[%c0, %c0_2] : memref<8x128xf32, #tpu.memory_space<vmem>>, vector<8x128xf32>
    %c1_i32 = arith.constant 1 : i32
    %c0_i32_3 = arith.constant 0 : i32
    %c0_i32_4 = arith.constant 0 : i32
    %3 = tpu.memref_slice %arg1[%c1_i32, %c0_i32_3, %c0_i32_4] : memref<2x8x128xf32, #tpu.memory_space<vmem>> -> memref<1x8x128xf32, #tpu.memory_space<vmem>>
    %4 = tpu.memref_squeeze %3 : memref<1x8x128xf32, #tpu.memory_space<vmem>> -> memref<8x128xf32, #tpu.memory_space<vmem>>
    %c0_5 = arith.constant 0 : index
    %c0_6 = arith.constant 0 : index
    %5 = vector.load %4[%c0_5, %c0_6] : memref<8x128xf32, #tpu.memory_space<vmem>>, vector<8x128xf32>
    %6 = arith.cmpf oge, %2, %5 : vector<8x128xf32>
    %7 = arith.extui %6 : vector<8x128xi1> to vector<8x128xi32>
    %c0_7 = arith.constant 0 : index
    %c0_8 = arith.constant 0 : index
    %8 = vector.load %arg2[%c0_7, %c0_8] : memref<8x128xi32, #tpu.memory_space<vmem>>, vector<8x128xi32>
    tpu.vector_store %arg2[%c0_7, %c0_8], %7 {strides = array<i32>} : memref<8x128xi32, #tpu.memory_space<vmem>>, vector<8x128xi32>,
    return
  }
  func.func @transform_0(%arg0: i32) -> (i32, i32, i32) {
    %c0_i32 = arith.constant 0 : i32
    %c0_i32_0 = arith.constant 0 : i32
    %c0_i32_1 = arith.constant 0 : i32
    return %c0_i32, %arg0, %c0_i32_0 : i32, i32, i32
  }
  func.func @transform_1(%arg0: i32) -> (i32, i32) {
    %c0_i32 = arith.constant 0 : i32
    %c0_i32_0 = arith.constant 0 : i32
    return %arg0, %c0_i32 : i32, i32
  }
}

</mosaic_0001>

<bundles_post_ra>
// kernel: tpu_custom_call.1
= control target key start
LH: loop header
LB: loop body
LE: loop exit
PB: predicated region body
PF: predicated region fallthrough
CT: control target
= control target key end

     0   :  { %6 = vsyncpa [#allocation3], 0  ;;  %s114_s0 = inlined_call_operand.hbm [shape: f32[2,8,128], index: 0, kind: input, shape index: {}]   ;;  %s115_s1 = inlined_call_operand.hbm [shape: s32[8,128], index: 1, kind: output, shape index: {}]  }
   0x1   :  { %7 = vsyncpa [#allocation4], 0  ;;  %s93_s6 = smov [#allocation2]  }
   0x2   :  { %s13_s7 = sshll.u32 %s93_s6, 4  ;;  %s14_s7 = int_to_ptr.vmem [resolvable:$true] %s13_s7 }
   0x3   :  { %s57_s8 = scalar_lea.vmem %s14_s7, 256  ;;  %p62_p1 = scmp.lt.s32.totalorder %s14_s7, %s14_s7 }
   0x4   :  { %p58_p0 = scmp.ne.s32.totalorder %s14_s7, %s57_s8  ;;  %p63_p2 = scmp.lt.s32.totalorder %s57_s8, %s57_s8 }
   0x6   :  { %p64_p3 = por %p63_p2, %p62_p1 }
   0x8   :  { %p65_p4 = pnand %p64_p3, %p58_p0 }
   0xa   :  { %68 = shalt.err (!%p65_p4)
}
   0xb   :  { %s94_s9 = smov 128   ;;  %s95_s10 = smov 8  }
   0xc   :  { %19 = dma.hbm_to_vmem [thread:$0]  %s114_s0, 256, %s14_s7, [#allocation3], %s94_s9, %s94_s9, %s95_s10  }
   0xd   :  { %89 = dma.done.wait [#allocation3], 256  }
   0xe   :  { %90 = vsyncadd [#allocation3], 4294967040  ;;  %s96_s13 = smov [#allocation5]   ;;  %v23_v0 = vld [vmem:[#allocation2] sm:$0xff]  ;;  %v25_v1 = vld [vmem:[#allocation2 + $0x8] sm:$0xff]  ;;  %v97_v2 = vmov 0  }
   0xf   :  { %s35_s14 = sshll.u32 %s96_s13, 4  ;;  %vm26_vm0 = vcmp.ge.f32.partialorder %v23_v0, %v25_v1  ;;  %s36_s14 = int_to_ptr.vmem [resolvable:$true] %s35_s14 }
  0x10   :  { %v27_v3 = vsel %vm26_vm0, 1, %v97_v2  ;;  %s69_s15 = scalar_lea.vmem %s36_s14, 128  ;;  %p74_p6 = scmp.lt.s32.totalorder %s36_s14, %s36_s14 }
  0x11   :  { %28 = vst [vmem:[#allocation5] sm:$0xff] %v27_v3  ;;  %p70_p5 = scmp.ne.s32.totalorder %s36_s14, %s69_s15  ;;  %p75_p7 = scmp.lt.s32.totalorder %s69_s15, %s69_s15 }
  0x13   :  { %p76_p8 = por %p75_p7, %p74_p6 }
  0x15   :  { %p77_p9 = pnand %p76_p8, %p70_p5 }
  0x17   :  { %80 = shalt.err (!%p77_p9)
}
  0x18   :  { %38 = dma.vmem_to_hbm [thread:$0]  %s36_s14, 128, %s115_s1, [#allocation4]  }
  0x19   :  { %91 = dma.done.wait [#allocation4], 128  }
  0x1a   :  { %92 = vsyncadd [#allocation4], 4294967168 }
  0x1b   :  { %42 = vsyncpa [#allocation3], 1 }
  0x1c   :  { %43 = vsyncpa [#allocation4], 1 }

</bundles_post_ra>
